<compile_context>
chip_gen: v5e
topology: v5e:2x2
jax: 0.10.0
libtpu: 0.0.40
codegen_flags: <defaults>
</compile_context>

<pallas_src>
import functools

import jax
import jax.numpy as jnp
from jax.experimental import pallas as pl
from jax.experimental.pallas import tpu as pltpu


_STATIC_SLAB_UNROLL = 8     # static Python loop for <= this many 128-lane slabs
_REG_ACC_LIMIT = 256        # register-resident accumulator only if NB*C <= this


# ----------------------------------------------------------------------------
# In-kernel helpers
# ----------------------------------------------------------------------------
def _slab_sum_reg(x_ref, acc, n_slabs):
    """acc + sum of the 128-lane slabs of x_ref, loading one slab at a time
    (no full-block f32 copy)."""
    if n_slabs <= _STATIC_SLAB_UNROLL:
        for s in range(n_slabs):
            acc = acc + x_ref[:, :, s * 128:(s + 1) * 128].astype(jnp.float32)
        return acc

    def body(s, a):
        off = pl.multiple_of(s * 128, 128)
        return a + x_ref[:, :, pl.ds(off, 128)].astype(jnp.float32)

    return jax.lax.fori_loop(0, n_slabs, body, acc, unroll=4)


def _slab_sum_rmw(x_ref, acc_ref, n_slabs):
    """Per-slab read-modify-write through VMEM scratch (for large NB*C the
    accumulator does not fit the vreg file; this avoids spills)."""
    if n_slabs <= _STATIC_SLAB_UNROLL:
        for s in range(n_slabs):
            acc_ref[...] += x_ref[:, :, s * 128:(s + 1) * 128].astype(jnp.float32)
        return

    def body(s, carry):
        off = pl.multiple_of(s * 128, 128)
        acc_ref[...] += x_ref[:, :, pl.ds(off, 128)].astype(jnp.float32)
        return carry

    jax.lax.fori_loop(0, n_slabs, body, 0, unroll=2)


def _pool_mlp_store(acc, w1t_ref, b1_ref, w2t_ref, b2_ref, o_ref, inv_hw):
    """One XLU lane-reduce + exact 1/HW scale + tiny MLP + sigmoid + store."""
    pooled = jnp.sum(acc, axis=-1) * inv_hw                          # (NB, C)
    h = jnp.dot(pooled, w1t_ref[...],
                preferred_element_type=jnp.float32) + b1_ref[...]
    h = jnp.maximum(h, 0.0)                                          # ReLU
    g = jnp.dot(h, w2t_ref[...],
                preferred_element_type=jnp.float32) + b2_ref[...]
    o_ref[...] = jax.nn.sigmoid(g).astype(o_ref.dtype)               # Sigmoid


# ----------------------------------------------------------------------------
# Kernels
# ----------------------------------------------------------------------------
def _ca_kernel_single(x_ref, w1t_ref, b1_ref, w2t_ref, b2_ref, o_ref, *,
                      n_slabs, inv_hw):
    # Fast path: whole (padded) HW in one block, register-resident accumulator,
    # no scratch / no pl.when phases.
    nb, c, _ = x_ref.shape
    acc = _slab_sum_reg(x_ref, jnp.zeros((nb, c, 128), jnp.float32), n_slabs)
    _pool_mlp_store(acc, w1t_ref, b1_ref, w2t_ref, b2_ref, o_ref, inv_hw)


def _ca_kernel_multi(x_ref, w1t_ref, b1_ref, w2t_ref, b2_ref, o_ref, acc_ref, *,
                     n_slabs, inv_hw, reg_resident):
    # x_ref:   (NB, C, CHUNK)  one HW chunk of a block of NB batch rows
    # acc_ref: (NB, C, 128)    f32 lane-folded partial sums (VMEM scratch)
    k = pl.program_id(1)

    @pl.when(k == 0)
    def _init():
        acc_ref[...] = jnp.zeros_like(acc_ref)

    if reg_resident:
        acc_ref[...] = _slab_sum_reg(x_ref, acc_ref[...], n_slabs)
    else:
        _slab_sum_rmw(x_ref, acc_ref, n_slabs)

    @pl.when(k == pl.num_programs(1) - 1)
    def _finalize():
        _pool_mlp_store(acc_ref[...], w1t_ref, b1_ref, w2t_ref, b2_ref,
                        o_ref, inv_hw)


# ----------------------------------------------------------------------------
# Wrapper
# ----------------------------------------------------------------------------
def _round_up(x, m):
    return (x + m - 1) // m * m


def _choose_chunk(hw, nb, c, itemsize, budget_bytes):
    """Return (chunk, hw_pad): chunk is a multiple of 128 fitting the per-buffer
    byte budget; hw_pad is hw rounded up to a multiple of chunk (zero-padded in
    the wrapper).  Prefers a divisor of hw (no padding copy) when hw is already
    a multiple of 128 and a non-degenerate divisor exists."""
    per_col = nb * c * itemsize
    max_chunk = max(128, (budget_bytes // max(1, per_col)) // 128 * 128)
    hw128 = _round_up(hw, 128)
    if hw128 <= max_chunk:
        return hw128, hw128                     # single block
    if hw % 128 == 0:
        chunk = max_chunk
        while chunk >= 128 and hw % chunk != 0:
            chunk -= 128
        if chunk >= 128 and chunk * 4 >= max_chunk:
            return chunk, hw                    # exact divisor, no padding copy
    # Ragged: stream max_chunk blocks, zero-pad the tail (exact mean kept).
    return max_chunk, _round_up(hw, max_chunk)


def ca_layer(x_nchw, w1, b1, w2, b2, *, batch_block=8,
             chunk_budget_bytes=8 << 20, core_parallel=False):
    """x_nchw: (N, C, H, W).
    w1: (Cr, C), b1: (Cr,)  from Conv2d(C, Cr, 1)
    w2: (C, Cr), b2: (C,)   from Conv2d(Cr, C, 1)
    Returns the (N, C, 1, 1) channel-attention gate (matches CALayer.forward).
    Set core_parallel=True on v7x (megacore) when N/NB >= 2 to drive both TCs."""
    N, C, H, W = x_nchw.shape
    Cr = w1.shape[0]
    HW = H * W
    itemsize = x_nchw.dtype.itemsize

    # Batch rows per grid step (NB must be a multiple of 8 or equal N so the
    # (NB, C) output block is legal).
    NB = N if N <= batch_block else max(8, (batch_block // 8) * 8)
    n_batch_blocks = pl.cdiv(N, NB)

    # Generation-aware VMEM ceiling (v7x: ~45 MiB; v5e/v6e: ~90 MiB).
    try:
        vmem_cap = int(0.7 * pltpu.get_tpu_info().vmem_capacity_bytes)
    except Exception:  # pragma: no cover - conservative fallback
        vmem_cap = 44 << 20
    budget = min(int(chunk_budget_bytes), max(1 << 20, vmem_cap // 3))

    CHUNK, HW_pad = _choose_chunk(HW, NB, C, itemsize, budget)
    n_slabs = CHUNK // 128
    n_hw_blocks = HW_pad // CHUNK
    reg_resident = (NB * C) <= _REG_ACC_LIMIT
    single = (n_hw_blocks == 1) and reg_resident

    x_flat = x_nchw.reshape(N, C, HW)
    if HW_pad != HW:
        # Zeros contribute nothing to the sum; the exact 1/HW scale is kept.
        x_flat = jnp.pad(x_flat, ((0, 0), (0, 0), (0, HW_pad - HW)))

    w1t = w1.T.astype(jnp.float32)              # (C, Cr)
    w2t = w2.T.astype(jnp.float32)              # (Cr, C)
    b1r = b1.reshape(1, Cr).astype(jnp.float32)
    b2r = b2.reshape(1, C).astype(jnp.float32)

    # Explicit VMEM budget with headroom, clamped by the generation-aware cap.
    weight_bytes = 4 * (2 * C * Cr + C + Cr)
    acc_bytes = 0 if single else NB * C * 128 * 4
    vmem_need = (2 * NB * C * CHUNK * itemsize + acc_bytes
                 + 2 * NB * C * itemsize + 2 * weight_bytes)
    vmem_limit = int(min(vmem_cap, max(32 << 20, vmem_need + (8 << 20))))

    cost = pl.CostEstimate(
        flops=int(N * C * HW + 4 * N * C * Cr),
        transcendentals=int(N * C),
        bytes_accessed=int(N * C * HW_pad * itemsize + weight_bytes
                           + N * C * itemsize),
    )

    if core_parallel and n_batch_blocks >= 2:
        batch_sem = pltpu.CORE_PARALLEL          # split batch blocks across TCs
    else:
        batch_sem = "parallel"

    if single:
        kernel = functools.partial(_ca_kernel_single, n_slabs=n_slabs,
                                   inv_hw=1.0 / HW)
        grid = (n_batch_blocks,)
        in_specs = [
            pl.BlockSpec((NB, C, CHUNK), lambda i: (i, 0, 0)),
            pl.BlockSpec((C, Cr),        lambda i: (0, 0)),
            pl.BlockSpec((1, Cr),        lambda i: (0, 0)),
            pl.BlockSpec((Cr, C),        lambda i: (0, 0)),
            pl.BlockSpec((1, C),         lambda i: (0, 0)),
        ]
        out_specs = pl.BlockSpec((NB, C), lambda i: (i, 0))
        scratch = []
        semantics = (batch_sem,)
    else:
        kernel = functools.partial(_ca_kernel_multi, n_slabs=n_slabs,
                                   inv_hw=1.0 / HW, reg_resident=reg_resident)
        grid = (n_batch_blocks, n_hw_blocks)      # HW reduction axis last
        in_specs = [
            pl.BlockSpec((NB, C, CHUNK), lambda i, k: (i, 0, k)),
            pl.BlockSpec((C, Cr),        lambda i, k: (0, 0)),
            pl.BlockSpec((1, Cr),        lambda i, k: (0, 0)),
            pl.BlockSpec((Cr, C),        lambda i, k: (0, 0)),
            pl.BlockSpec((1, C),         lambda i, k: (0, 0)),
        ]
        out_specs = pl.BlockSpec((NB, C), lambda i, k: (i, 0))
        scratch = [pltpu.VMEM((NB, C, 128), jnp.float32)]
        semantics = (batch_sem, "arbitrary")

    out = pl.pallas_call(
        kernel,
        out_shape=jax.ShapeDtypeStruct((N, C), x_nchw.dtype),
        grid_spec=pltpu.PrefetchScalarGridSpec(
            num_scalar_prefetch=0,
            grid=grid,
            in_specs=in_specs,
            out_specs=out_specs,
            scratch_shapes=scratch,
        ),
        compiler_params=pltpu.CompilerParams(
            dimension_semantics=semantics,
            vmem_limit_bytes=vmem_limit),
        cost_estimate=cost,
    )(x_flat, w1t, b1r, w2t, b2r)

    return out.reshape(N, C, 1, 1)


# ----------------------------------------------------------------------------
# Reference + tests
# ----------------------------------------------------------------------------
def _reference(x, w1, b1, w2, b2):
    pooled = jnp.mean(x.astype(jnp.float32), axis=(2, 3))       # (N, C)
    h = jnp.maximum(pooled @ w1.T + b1, 0.0)                    # (N, Cr)
    g = jax.nn.sigmoid(h @ w2.T + b2)                           # (N, C)
    return g[:, :, None, None]


def _make_params(key, C, Cr):
    k1, k2, k3, k4 = jax.random.split(key, 4)
    bound1 = 1.0 / (C ** 0.5)
    w1 = jax.random.uniform(k1, (Cr, C), minval=-bound1, maxval=bound1,
                            dtype=jnp.float32)
    b1 = jax.random.uniform(k2, (Cr,), minval=-bound1, maxval=bound1,
                            dtype=jnp.float32)
    bound2 = 1.0 / (Cr ** 0.5)
    w2 = jax.random.uniform(k3, (C, Cr), minval=-bound2, maxval=bound2,
                            dtype=jnp.float32)
    b2 = jax.random.uniform(k4, (C,), minval=-bound2, maxval=bound2,
                            dtype=jnp.float32)
    return w1, b1, w2, b2


if __name__ == "__main__":
    key = jax.random.PRNGKey(0)
    kp, kp2, kx1, kx3, kx5, kx6 = jax.random.split(key, 6)

    def check(y, r, atol, name):
        assert y.shape == r.shape, (name, y.shape, r.shape)
        err = float(jnp.max(jnp.abs(y.astype(jnp.float32) - r)))
        assert err <= atol, (name, err)

    # channel=32, reduction=16 -> hidden=2
    C, Cr = 32, 2
    w1, b1, w2, b2 = _make_params(kp, C, Cr)

    # 1) single-chunk, register-resident fast path (16x16 -> 2 slabs).
    x1 = jax.random.normal(kx1, (2, C, 16, 16), dtype=jnp.float32)
    y1 = jax.block_until_ready(ca_layer(x1, w1, b1, w2, b2))
    check(y1, _reference(x1, w1, b1, w2, b2), 1e-5, "single")

    # 2) multi-chunk HW reduction (tiny budget -> CHUNK=128, 2 chunks).
    y2 = jax.block_until_ready(
        ca_layer(x1, w1, b1, w2, b2, chunk_budget_bytes=32 * 1024))
    check(y2, _reference(x1, w1, b1, w2, b2), 1e-5, "multi")

    # 3) HW not a multiple of 128 -> zero-padded to 128; exact 1/HW mean.
    x3 = jax.random.normal(kx3, (2, C, 10, 10), dtype=jnp.float32)
    y3 = jax.block_until_ready(ca_layer(x3, w1, b1, w2, b2))
    check(y3, _reference(x3, w1, b1, w2, b2), 1e-5, "pad128")

    # 4) large NB*C -> VMEM read-modify-write accumulator path (C=256).
    C4, Cr4 = 256, 16
    w14, b14, w24, b24 = _make_params(kp2, C4, Cr4)
    x4 = jax.random.normal(kx5, (2, C4, 16, 16), dtype=jnp.float32)
    y4 = jax.block_until_ready(ca_layer(x4, w14, b14, w24, b24))
    check(y4, _reference(x4, w14, b14, w24, b24), 1e-5, "rmw")

    # 5) ragged HW with multi-chunk streaming (320 -> padded to 384, 3 chunks).
    x5 = jax.random.normal(kx6, (2, C, 16, 20), dtype=jnp.float32)
    y5 = jax.block_until_ready(
        ca_layer(x5, w1, b1, w2, b2, chunk_budget_bytes=32 * 1024))
    check(y5, _reference(x5, w1, b1, w2, b2), 1e-5, "ragged-multi")

    # 6) bf16 input + fori_loop slab path (HW=2048 -> 16 slabs).
    x6 = jax.random.normal(kx1, (2, C, 32, 64),
                           dtype=jnp.float32).astype(jnp.bfloat16)
    y6 = jax.block_until_ready(ca_layer(x6, w1, b1, w2, b2))
    check(y6, _reference(x6, w1, b1, w2, b2), 1e-2, "bf16-fori")

    print("KERNEL_OK")
</pallas_src>

<mosaic_0001>
module attributes {stable_mosaic.version = 11 : i64} {
  func.func @_ca_kernel_single(%arg0: i32, %arg1: memref<2x32x256xf32, #tpu.memory_space<vmem>>, %arg2: memref<32x2xf32, #tpu.memory_space<vmem>>, %arg3: memref<1x2xf32, #tpu.memory_space<vmem>>, %arg4: memref<2x32xf32, #tpu.memory_space<vmem>>, %arg5: memref<1x32xf32, #tpu.memory_space<vmem>>, %arg6: memref<2x32xf32, #tpu.memory_space<vmem>>) attributes {dimension_semantics = [#tpu.dimension_semantics<parallel>], iteration_bounds = array<i64: 1>, scalar_prefetch = 0 : i64, scratch_operands = 0 : i64, tpu.core_type = #tpu.core_type<tc>, window_params = [{transform_indices = @transform_0, window_bounds = array<i64: 2, 32, 256>}, {pipeline_mode = #tpu.pipeline_mode<synchronous>, transform_indices = @transform_1, window_bounds = array<i64: 32, 2>}, {pipeline_mode = #tpu.pipeline_mode<synchronous>, transform_indices = @transform_2, window_bounds = array<i64: 1, 2>}, {pipeline_mode = #tpu.pipeline_mode<synchronous>, transform_indices = @transform_3, window_bounds = array<i64: 2, 32>}, {pipeline_mode = #tpu.pipeline_mode<synchronous>, transform_indices = @transform_4, window_bounds = array<i64: 1, 32>}, {transform_indices = @transform_5, window_bounds = array<i64: 2, 32>}]} {
    %cst = arith.constant 0.000000e+00 : f32
    %0 = vector.broadcast %cst : f32 to vector<2x32x128xf32>
    %c0 = arith.constant 0 : index
    %c0_0 = arith.constant 0 : index
    %c0_1 = arith.constant 0 : index
    %1 = vector.load %arg1[%c0, %c0_0, %c0_1] : memref<2x32x256xf32, #tpu.memory_space<vmem>>, vector<2x32x128xf32>
    %2 = arith.addf %0, %1 : vector<2x32x128xf32>
    %c0_2 = arith.constant 0 : index
    %c0_3 = arith.constant 0 : index
    %c128 = arith.constant 128 : index
    %3 = vector.load %arg1[%c0_2, %c0_3, %c128] : memref<2x32x256xf32, #tpu.memory_space<vmem>>, vector<2x32x128xf32>
    %4 = arith.addf %2, %3 : vector<2x32x128xf32>
    %cst_4 = arith.constant dense<0.000000e+00> : vector<2x32xf32>
    %5 = vector.multi_reduction <add>, %4, %cst_4 [2] : vector<2x32x128xf32> to vector<2x32xf32>
    %cst_5 = arith.constant 3.906250e-03 : f32
    %6 = vector.broadcast %cst_5 : f32 to vector<2x32xf32>
    %7 = arith.mulf %5, %6 : vector<2x32xf32>
    %c0_6 = arith.constant 0 : index
    %c0_7 = arith.constant 0 : index
    %8 = vector.load %arg2[%c0_6, %c0_7] : memref<32x2xf32, #tpu.memory_space<vmem>>, vector<32x2xf32>
    %cst_8 = arith.constant dense<0.000000e+00> : vector<2x2xf32>
    %9 = tpu.matmul %7, %8, %cst_8 {dimension_numbers = #tpu.dot_dimension_numbers<[1], [0], [0], [1], [0, 0, 1, 1], [], []>} : vector<2x32xf32>, vector<32x2xf32>, vector<2x2xf32> -> vector<2x2xf32>
    %c0_9 = arith.constant 0 : index
    %c0_10 = arith.constant 0 : index
    %10 = vector.load %arg3[%c0_9, %c0_10] : memref<1x2xf32, #tpu.memory_space<vmem>>, vector<1x2xf32>
    %11 = vector.broadcast %10 : vector<1x2xf32> to vector<2x2xf32>
    %12 = arith.addf %9, %11 : vector<2x2xf32>
    %cst_11 = arith.constant 0.000000e+00 : f32
    %13 = vector.broadcast %cst_11 : f32 to vector<2x2xf32>
    %14 = arith.maximumf %12, %13 : vector<2x2xf32>
    %c0_12 = arith.constant 0 : index
    %c0_13 = arith.constant 0 : index
    %15 = vector.load %arg4[%c0_12, %c0_13] : memref<2x32xf32, #tpu.memory_space<vmem>>, vector<2x32xf32>
    %cst_14 = arith.constant dense<0.000000e+00> : vector<2x32xf32>
    %16 = tpu.matmul %14, %15, %cst_14 {dimension_numbers = #tpu.dot_dimension_numbers<[1], [0], [0], [1], [0, 0, 1, 1], [], []>} : vector<2x2xf32>, vector<2x32xf32>, vector<2x32xf32> -> vector<2x32xf32>
    %c0_15 = arith.constant 0 : index
    %c0_16 = arith.constant 0 : index
    %17 = vector.load %arg5[%c0_15, %c0_16] : memref<1x32xf32, #tpu.memory_space<vmem>>, vector<1x32xf32>
    %18 = vector.broadcast %17 : vector<1x32xf32> to vector<2x32xf32>
    %19 = arith.addf %16, %18 : vector<2x32xf32>
    %20 = arith.negf %19 : vector<2x32xf32>
    %21 = math.exp %20 : vector<2x32xf32>
    %cst_17 = arith.constant 1.000000e+00 : f32
    %22 = vector.broadcast %cst_17 : f32 to vector<2x32xf32>
    %23 = arith.addf %22, %21 : vector<2x32xf32>
    %24 = arith.divf %22, %23 : vector<2x32xf32>
    %c0_18 = arith.constant 0 : index
    %c0_19 = arith.constant 0 : index
    %25 = vector.load %arg6[%c0_18, %c0_19] : memref<2x32xf32, #tpu.memory_space<vmem>>, vector<2x32xf32>
    tpu.vector_store %arg6[%c0_18, %c0_19], %24 {strides = array<i32>} : memref<2x32xf32, #tpu.memory_space<vmem>>, vector<2x32xf32>,
    return
  }
  func.func @transform_0(%arg0: i32) -> (i32, i32, i32) {
    %c0_i32 = arith.constant 0 : i32
    %c0_i32_0 = arith.constant 0 : i32
    %c0_i32_1 = arith.constant 0 : i32
    return %arg0, %c0_i32, %c0_i32_0 : i32, i32, i32
  }
  func.func @transform_1(%arg0: i32) -> (i32, i32) {
    %c0_i32 = arith.constant 0 : i32
    %c0_i32_0 = arith.constant 0 : i32
    %c0_i32_1 = arith.constant 0 : i32
    return %c0_i32, %c0_i32_0 : i32, i32
  }
  func.func @transform_2(%arg0: i32) -> (i32, i32) {
    %c0_i32 = arith.constant 0 : i32
    %c0_i32_0 = arith.constant 0 : i32
    %c0_i32_1 = arith.constant 0 : i32
    return %c0_i32, %c0_i32_0 : i32, i32
  }
  func.func @transform_3(%arg0: i32) -> (i32, i32) {
    %c0_i32 = arith.constant 0 : i32
    %c0_i32_0 = arith.constant 0 : i32
    %c0_i32_1 = arith.constant 0 : i32
    return %c0_i32, %c0_i32_0 : i32, i32
  }
  func.func @transform_4(%arg0: i32) -> (i32, i32) {
    %c0_i32 = arith.constant 0 : i32
    %c0_i32_0 = arith.constant 0 : i32
    %c0_i32_1 = arith.constant 0 : i32
    return %c0_i32, %c0_i32_0 : i32, i32
  }
  func.func @transform_5(%arg0: i32) -> (i32, i32) {
    %c0_i32 = arith.constant 0 : i32
    %c0_i32_0 = arith.constant 0 : i32
    return %arg0, %c0_i32 : i32, i32
  }
}

</mosaic_0001>

<bundles_post_ra>
// kernel: tpu_custom_call.1
= control target key start
LH: loop header
LB: loop body
LE: loop exit
PB: predicated region body
PF: predicated region fallthrough
CT: control target
= control target key end

     0   :  { %10 = vsyncpa [#allocation3], 0  ;;  %s355_s0 = inlined_call_operand.hbm [shape: f32[2,32,256], index: 0, kind: input, shape index: {}]   ;;  %s356_s1 = inlined_call_operand.vmem [shape: f32[32,2], index: 1, kind: input, shape index: {}]   ;;  %s357_s2 = inlined_call_operand.vmem [shape: f32[1,2], index: 2, kind: input, shape index: {}]   ;;  %s358_s3 = inlined_call_operand.vmem [shape: f32[2,32], index: 3, kind: input, shape index: {}]   ;;  %s359_s4 = inlined_call_operand.vmem [shape: f32[1,32], index: 4, kind: input, shape index: {}]   ;;  %s360_s5 = inlined_call_operand.hbm [shape: f32[2,32], index: 5, kind: output, shape index: {}]  }
   0x1   :  { %11 = vsyncpa [#allocation4], 0  ;;  %s16_s20 = sshll.u32 %s355_s0, 4  ;;  %s294_s21 = smov [#allocation2]   ;;  %s17_s20 = int_to_ptr.hbm [resolvable:$true] %s16_s20 }
   0x2   :  { %s18_s22 = sshll.u32 %s294_s21, 4  ;;  %s295_s23 = smov 256   ;;  %s19_s22 = int_to_ptr.vmem [resolvable:$true] %s18_s22 }
   0x3   :  { %s296_s24 = smov 16  }
   0x4   :  { %24 = dma.hbm_to_vmem [thread:$0]  %s17_s20, 2048, %s19_s22, [#allocation3], %s295_s23, %s295_s23, %s296_s24  }
   0x5   :  { %290 = dma.done.wait [#allocation3], 2048  }
   0x6   :  { %291 = vsyncadd [#allocation3], 4294965248  ;;  %v41_v0 = vld [vmem:[#allocation2 + $0x40] sm:$0xff]  ;;  %v57_v1 = vld [vmem:[#allocation2 + $0x48] sm:$0xff]  ;;  %v109_v31 = vlaneseq  ;;  %vm114_vm0 = vcmask 130112   ;;  %vm118_vm1 = vcmask 195712  }
   0x7   :  { %v37_v2 = vld [vmem:[#allocation2] sm:$0xff]  ;;  %v65_v3 = vadd.f32 %v57_v1, %v41_v0  ;;  %v53_v4 = vld [vmem:[#allocation2 + $0x8] sm:$0xff]  ;;  %v42_v9 = vld [vmem:[#allocation2 + $0x50] sm:$0xff]  ;;  %vm122_vm2 = vcmask 261312   ;;  %vm131_vm3 = vcmask 1041409   ;;  %vm133_vm4 = vcmask 261120  }
   0x8   :  { %v39_v5 = vld [vmem:[#allocation2 + $0x20] sm:$0xff]  ;;  %v55_v6 = vld [vmem:[#allocation2 + $0x28] sm:$0xff]  ;;  %v61_v7 = vadd.f32 %v53_v4, %v37_v2  ;;  %v58_v10 = vld [vmem:[#allocation2 + $0x58] sm:$0xff]  ;;  %v110_v32 = vand.u32 127, %v109_v31  ;;  %vm166_vm5 = vcmask 1041408   ;;  %vm162_vm6 = vcmask 15360  }
   0x9   :  { %v63_v8 = vadd.f32 %v55_v6, %v39_v5  ;;  %77 = vadd.xlane.f32.xlu1 %v65_v3  ;;  %v38_v11 = vld [vmem:[#allocation2 + $0x10] sm:$0xff]  ;;  %v54_v12 = vld [vmem:[#allocation2 + $0x18] sm:$0xff]  ;;  %v43_v13 = vld [vmem:[#allocation2 + $0x60] sm:$0xff]  ;;  %v66_v15 = vadd.f32 %v58_v10, %v42_v9  ;;  %vm209_vm10 = vcmask 254976  }
   0xa   :  { %69 = vadd.xlane.f32.xlu0 %v61_v7  ;;  %v59_v14 = vld [vmem:[#allocation2 + $0x68] sm:$0xff]  ;;  %v62_v16 = vadd.f32 %v54_v12, %v38_v11  ;;  %v44_v18 = vld [vmem:[#allocation2 + $0x70] sm:$0xff]  ;;  %v60_v19 = vld [vmem:[#allocation2 + $0x78] sm:$0xff]  ;;  %v112_v34 = vadd.s32 4294967288, %v110_v32  ;;  %v116_v43 = vadd.s32 4294967280, %v110_v32  ;;  %v120_v47 = vadd.s32 4294967272, %v110_v32 }
   0xb   :  { %73 = vadd.xlane.f32.xlu2 %v63_v8  ;;  %v67_v17 = vadd.f32 %v59_v14, %v43_v13  ;;  %v40_v20 = vld [vmem:[#allocation2 + $0x30] sm:$0xff]  ;;  %v56_v21 = vld [vmem:[#allocation2 + $0x38] sm:$0xff]  ;;  %v68_v22 = vadd.f32 %v60_v19, %v44_v18  ;;  %v94_v26 = vld [vmem:[%s356_s1 + $0x8] sm:$0xff] }
   0xc   :  { %v64_v23 = vadd.f32 %v56_v21, %v40_v20  ;;  %v96_v24 = vld [vmem:[%s356_s1 + $0x18] sm:$0xff]  ;;  %v95_v25 = vld [vmem:[%s356_s1 + $0x10] sm:$0xff]  ;;  %v93_v27 = vld [vmem:[%s356_s1] sm:$0xff] }
   0xd   :  { %148 = vmatpush.msra.mxu0 %v96_v24  ;;  %v157_v0 = vld [vmem:[%s358_s3] sm:$0x3] }
   0xe   :  { %229 = vmatpush.msk.msra.mxu1 %vm166_vm5, %v157_v0  ;;  %v236_v1 = vld [vmem:[%s357_s2] ss:$0 sm:$0xff]  ;;  %s297_s2 = smov [#allocation5]  }
   0xf   :  { %149 = vmatpush.msra.mxu0 %v95_v25  ;;  %v237_v5 = vld [vmem:[%s359_s4] ss:$0 sm:$0xff]  ;;  %s216_s3 = sshll.u32 %s297_s2, 4  ;;  %s218_s4 = sshll.u32 %s360_s5, 4  ;;  %s217_s3 = int_to_ptr.vmem [resolvable:$true] %s216_s3  ;;  %s219_s4 = int_to_ptr.hbm [resolvable:$true] %s218_s4 }
  0x11   :  { %79 = vadd.xlane.f32.xlu1 %v66_v15  ;;  %150 = vmatpush.msra.mxu0 %v94_v26 }
  0x12   :  { %71 = vadd.xlane.f32.xlu0 %v62_v16 }
  0x13   :  { %81 = vadd.xlane.f32.xlu2 %v67_v17  ;;  %151 = vmatpush.msra.mxu0 %v93_v27 }
  0x19   :  { %83 = vadd.xlane.f32.xlu1 %v68_v22 }
  0x1a   :  { %75 = vadd.xlane.f32.xlu0 %v64_v23 }
  0x7c   :  { %v78_v28 = vpop.xlane.xlu1 %77 }
  0x7d   :  { %v70_v29 = vpop.xlane.xlu0 %69  ;;  %v89_v39 = vmul.f32 0.00390625, %v78_v28 }
  0x7e   :  { %v74_v30 = vpop.xlane.xlu2 %73  ;;  %v85_v40 = vmul.f32 0.00390625, %v70_v29 }
  0x7f   :  { %v124_v45 = vperm.slane %v89_v39, %v110_v32  ;;  %v87_v46 = vmul.f32 0.00390625, %v74_v30 }
  0x80   :  { %v111_v48 = vperm.slane %v85_v40, %v110_v32 }
  0x81   :  { %v117_v56 = vperm.slane %v87_v46, %v116_v43 }
  0x84   :  { %v80_v33 = vpop.xlane.xlu1 %79 }
  0x85   :  { %v90_v35 = vmul.f32 0.00390625, %v80_v33  ;;  %v72_v36 = vpop.xlane.xlu0 %71 }
  0x86   :  { %v82_v37 = vpop.xlane.xlu2 %81  ;;  %v86_v38 = vmul.f32 0.00390625, %v72_v36 }
  0x87   :  { %v91_v41 = vmul.f32 0.00390625, %v82_v37  ;;  %v125_v42 = vperm.slane %v90_v35, %v112_v34 }
  0x88   :  { %v113_v44 = vperm.slane %v86_v38, %v112_v34 }
  0x89   :  { %v127_v49 = vperm.slane %v91_v41, %v116_v43  ;;  %v126_v51 = vsel %vm114_vm0, %v125_v42, %v124_v45 }
  0x8a   :  { %v115_v54 = vsel %vm114_vm0, %v113_v44, %v111_v48 }
  0x8b   :  { %v128_v59 = vsel %vm118_vm1, %v127_v49, %v126_v51  ;;  %v119_v60 = vsel %vm118_vm1, %v117_v56, %v115_v54 }
  0x8c   :  { %v84_v50 = vpop.xlane.xlu1 %83 }
  0x8d   :  { %v92_v52 = vmul.f32 0.00390625, %v84_v50  ;;  %v76_v53 = vpop.xlane.xlu0 %75 }
  0x8e   :  { %v88_v55 = vmul.f32 0.00390625, %v76_v53 }
  0x8f   :  { %v129_v57 = vperm.slane %v92_v52, %v120_v47 }
  0x90   :  { %v121_v58 = vperm.slane %v88_v55, %v120_v47 }
  0x91   :  { %v130_v61 = vsel %vm122_vm2, %v129_v57, %v128_v59 }
  0x92   :  { %v123_v62 = vsel %vm122_vm2, %v121_v58, %v119_v60 }
  0x93   :  { %v132_v63 = vsel %vm131_vm3, %v130_v61, %v123_v62 }
  0x94   :  { %228 = vmatmul.msk.f32.vlgmr.msra.gmra.mxu0 %vm133_vm4, %v132_v63 }
 0x111   :  { %v153_v2 = vpop.f32.mrf.mxu0 }
 0x112   :  { %v154_v3 = vadd.f32 %v236_v1, %v153_v2 }
 0x114   :  { %v156_v4 = vmax.f32 %v154_v3, 0.0 }
 0x116   :  { %230 = vmatmul.msk.f32.vlgmr.msra.gmra.mxu1 %vm162_vm6, %v156_v4 }
 0x193   :  { %v187_v6 = vpop.f32.mrf.mxu1 }
 0x194   :  { %v188_v7 = vadd.f32 %v237_v5, %v187_v6 }
 0x196   :  { %v231_v8 = vmul.f32 -1.442695, %v188_v7 }
 0x198   :  { %238 = vpow2.f32 %v231_v8 }
 0x19e   :  { %v239_v9 = vpop.eup %238 }
 0x19f   :  { %v193_v10 = vadd.f32 1.0, %v239_v9 }
 0x1a1   :  { %240 = vrcp.f32 %v193_v10  ;;  %v205_v14 = vand.u32 2147483648, %v193_v10  ;;  %v203_v16 = vand.u32 2147483647, %v193_v10  ;;  %vm199_vm8 = vweird.f32 %v193_v10 }
 0x1a3   :  { %v206_v18 = vor.u32 1.1754944e-38, %v205_v14  ;;  %vm204_vm11 = vcmp.eq.f32.partialorder %v203_v16, 8.507059e+37 }
 0x1a7   :  { %v241_v11 = vpop.eup %240 }
 0x1a8   :  { %v195_v12 = vmul.f32 %v241_v11, %v193_v10  ;;  %vm200_vm7 = vweird.f32 %v241_v11 }
 0x1a9   :  { %vm201_vm9 = vmor %vm199_vm8, %vm200_vm7 }
 0x1aa   :  { %v196_v13 = vsub.f32 1.0, %v195_v12 }
 0x1ac   :  { %v197_v15 = vmul.f32 %v241_v11, %v196_v13 }
 0x1ae   :  { %v198_v17 = vadd.f32 %v241_v11, %v197_v15 }
 0x1b0   :  { %v202_v19 = vsel %vm201_vm9, %v241_v11, %v198_v17 }
 0x1b1   :  { %v207_v20 = vsel %vm204_vm11, %v206_v18, %v202_v19 }
 0x1b2   :  { %210 = vst.msk [vmem:[#allocation5] sm:$0x3] %vm209_vm10, %v207_v20 }
 0x1b3   :  { %221 = dma.vmem_to_hbm [thread:$0]  %s217_s3, 32, %s219_s4, [#allocation4]  }
 0x1b4   :  { %292 = dma.done.wait [#allocation4], 32  }
 0x1b5   :  { %293 = vsyncadd [#allocation4], 4294967264 }
 0x1b6   :  { %226 = vsyncpa [#allocation3], 1 }
 0x1b7   :  { %227 = vsyncpa [#allocation4], 1 }

</bundles_post_ra>
